<compile_context>
chip_gen: v6e
topology: v6e:2x2x1
jax: 0.10.0
libtpu: 0.0.40
codegen_flags: <defaults>
</compile_context>

<pallas_src>
import functools
import math

import jax
import jax.numpy as jnp
from jax.experimental import pallas as pl
from jax.experimental.pallas import tpu as pltpu


# ---------------------------------------------------------------------------
# Kernel: per-slab 2-D transpose   (1, M, TN) -> (1, TN, M)
# ---------------------------------------------------------------------------
def _transpose2d_kernel(x_ref, o_ref):
    o_ref[0] = x_ref[0].T


# ---------------------------------------------------------------------------
# Decompose `dims` into identity-prefix + rotation (if possible)
# ---------------------------------------------------------------------------
def _grouped_rotation(dims):
    """Return (k, s) if dims = (0..k-1) ++ rotation-by-s of (k..n-1), else None."""
    n = len(dims)
    k = 0
    while k < n and dims[k] == k:
        k += 1
    if k == n:                      # identity (handled by caller)
        return None
    r = n - k
    s = dims[k] - k
    expect = tuple(k + (s + i) % r for i in range(r))
    if 0 < s < r and dims[k:] == expect:
        return k, s
    return None


# ---------------------------------------------------------------------------
# Wrapper: Permute(dims).forward(x)
# ---------------------------------------------------------------------------
def permute(x, dims):
    dims = tuple(int(d) for d in dims)
    n = x.ndim
    assert sorted(dims) == list(range(n)), f"invalid dims {dims} for ndim {n}"

    if dims == tuple(range(n)):     # identity permute: a view, no data movement
        return x

    out_shape = tuple(x.shape[d] for d in dims)

    rot = _grouped_rotation(dims)
    if rot is None:
        # TODO(synk): non-grouped permutes have no single-transpose Pallas form;
        # defer to XLA's copy instead of faking a multi-pass kernel.
        return jnp.transpose(x, dims)

    k, s = rot
    bflat = math.prod(x.shape[:k]) if k else 1
    m = math.prod(x.shape[k:k + s])
    nn = math.prod(x.shape[k + s:])

    # Free row-major collapse (metadata only, no HBM traffic).
    x3 = x.reshape(bflat, m, nn)

    # Lane-aligned N tile: big enough to stream near HBM roofline, small enough
    # to keep the double-buffered in/out slabs comfortably inside VMEM.
    tn = nn
    for cand in (1024, 512, 256, 128):
        if nn > cand and nn % cand == 0:
            tn = cand
            break
    grid = (bflat, nn // tn)

    y3 = pl.pallas_call(
        _transpose2d_kernel,
        out_shape=jax.ShapeDtypeStruct((bflat, nn, m), x.dtype),
        grid=grid,
        in_specs=[pl.BlockSpec((1, m, tn), lambda b, j: (b, 0, j))],
        out_specs=pl.BlockSpec((1, tn, m), lambda b, j: (b, j, 0)),
        compiler_params=pltpu.CompilerParams(
            dimension_semantics=("parallel", "parallel"),
            vmem_limit_bytes=32 * 1024 * 1024),
    )(x3)

    # Free row-major expansion back to the permuted shape.
    return y3.reshape(out_shape)


# ---------------------------------------------------------------------------
# Demo / self-check
# ---------------------------------------------------------------------------
if __name__ == "__main__":
    key = jax.random.PRNGKey(0)
    B, C, H, W = 2, 4, 16, 16
    x = jax.random.normal(key, (B, C, H, W), jnp.float32)   # NCHW, like PyTorch

    # Permute((0, 2, 3, 1)): NCHW -> NHWC (as used around LayerNorm in AE_Pair).
    dims = (0, 2, 3, 1)
    y = jax.jit(functools.partial(permute, dims=dims))(x)
    y = jax.block_until_ready(y)
    assert y.shape == (B, H, W, C), y.shape
    assert jnp.array_equal(y, jnp.transpose(x, dims))

    # Permute((0, 3, 1, 2)): NHWC -> NCHW (the inverse permute in the block).
    dims_inv = (0, 3, 1, 2)
    z = jax.jit(functools.partial(permute, dims=dims_inv))(y)
    z = jax.block_until_ready(z)
    assert z.shape == (B, C, H, W), z.shape
    assert jnp.array_equal(z, x)

    print("KERNEL_OK")
</pallas_src>

<mosaic_0001>
module attributes {stable_mosaic.version = 11 : i64} {
  func.func @_transpose2d_kernel(%arg0: i32, %arg1: i32, %arg2: memref<1x4x128xf32, #tpu.memory_space<vmem>>, %arg3: memref<1x128x4xf32, #tpu.memory_space<vmem>>) attributes {dimension_semantics = [#tpu.dimension_semantics<parallel>, #tpu.dimension_semantics<parallel>], iteration_bounds = array<i64: 2, 2>, scalar_prefetch = 0 : i64, scratch_operands = 0 : i64, tpu.core_type = #tpu.core_type<tc>, window_params = [{transform_indices = @transform_0, window_bounds = array<i64: 1, 4, 128>}, {transform_indices = @transform_1, window_bounds = array<i64: 1, 128, 4>}]} {
    %c0 = arith.constant 0 : index
    %c0_0 = arith.constant 0 : index
    %c0_1 = arith.constant 0 : index
    %0 = vector.load %arg2[%c0, %c0_0, %c0_1] : memref<1x4x128xf32, #tpu.memory_space<vmem>>, vector<1x4x128xf32>
    %1 = vector.shape_cast %0 : vector<1x4x128xf32> to vector<4x128xf32>
    %2 = tpu.transpose %1, [1, 0] : vector<4x128xf32> -> vector<128x4xf32>
    %c0_2 = arith.constant 0 : index
    %c0_3 = arith.constant 0 : index
    %c0_4 = arith.constant 0 : index
    %3 = vector.load %arg3[%c0_2, %c0_3, %c0_4] : memref<1x128x4xf32, #tpu.memory_space<vmem>>, vector<1x128x4xf32>
    %4 = vector.shape_cast %3 : vector<1x128x4xf32> to vector<128x4xf32>
    %5 = vector.shape_cast %2 : vector<128x4xf32> to vector<1x128x4xf32>
    tpu.vector_store %arg3[%c0_2, %c0_3, %c0_4], %5 {strides = array<i32>} : memref<1x128x4xf32, #tpu.memory_space<vmem>>, vector<1x128x4xf32>,
    return
  }
  func.func @transform_0(%arg0: i32, %arg1: i32) -> (i32, i32, i32) {
    %c0_i32 = arith.constant 0 : i32
    %c0_i32_0 = arith.constant 0 : i32
    return %arg0, %c0_i32, %arg1 : i32, i32, i32
  }
  func.func @transform_1(%arg0: i32, %arg1: i32) -> (i32, i32, i32) {
    %c0_i32 = arith.constant 0 : i32
    %c0_i32_0 = arith.constant 0 : i32
    return %arg0, %arg1, %c0_i32 : i32, i32, i32
  }
}

</mosaic_0001>

<bundles_post_ra>
// kernel: permute.1
= control target key start
LH: loop header
LB: loop body
LE: loop exit
PB: predicated region body
PF: predicated region fallthrough
CT: control target
= control target key end

     0   :  { %s394_s6 = smov 0   ;;  %s396_s7 = smov 0   ;;  %s479_s0 = inlined_call_operand.vmem [shape: f32[2,4,256], index: 0, kind: input, shape index: {}]   ;;  %s480_s1 = inlined_call_operand.vmem [shape: f32[2,256,4], index: 1, kind: output, shape index: {}]  }
   0x1   :  { %s398_s8 = smov 0   ;;  %s400_s9 = smov 0  }
   0x2   :  { %s402_s10 = smov 0  }
   0x3 LB: > { %s20_s11 = sadd.s32 1, %s374_s8  ;;  %s23_s12 = sadd.s32 1, %s378_s9  ;;  %s382_s10 = sphi %s402_s10, %s11_s10   ;;  %s378_s9 = sphi %s400_s9, %s484_s9   ;;  %s374_s8 = sphi %s398_s8, %s483_s8   ;;  %s370_s7 = sphi %s396_s7, %s482_s7   ;;  %s366_s6 = sphi %s394_s6, %s481_s6  }
   0x4   : > { %p21_p0 = scmp.ge.s32.totalorder %s20_s11, 2  ;;  %p295_p1 = scmp.ge.s32.totalorder %s382_s10, 1 }
   0x5   : > { %p106_p2 = scmp.lt.s32.totalorder %s382_s10, 5 }
   0x6   : > { %s486_s11 = smov (%p21_p0, %s20_s11), 0  ;;  %s488_s12 = smov (!%p21_p0, %s23_s12), %s378_s9 }
   0x7   : > { %p107_p3 = pnand %p295_p1, %p106_p2  ;;  %p25_p4 = scmp.ge.s32.totalorder %s488_s12, 2 }
   0x8   : > { %p133_p5 = scmp.lt.s32.totalorder (!%p107_p3), %s370_s7, 1  ;;  %p135_p6 = scmp.lt.s32.totalorder (!%p107_p3), %s366_s6, 1 }
   0x9   : > { %s490_s12 = smov (%p25_p4, %s488_s12), 0  ;;  %110 = sbr.rel (%p107_p3) target bundleno = 207 (0xcf), region = 24 }
   0xa   : > { %s298_s20 = sshll.u32 (!%p107_p3), %s366_s6, 4 }
   0xb   : > { %p144_p7 = scmp.lt.s32.totalorder (!%p107_p3), %s298_s20, 31 }
   0xe   : > { %s492_s7 = smov (!%p133_p5, %s370_s7), 1  ;;  %s494_s20 = smov (!%p144_p7, %s298_s20), 31  ;;  %vm184_vm0 = vcmask 31744  }
   0xf   : > { %s136_s13 = scalar_select %p135_p6, %s366_s6, 1 }
  0x10   : > { %s296_s14 = sshll.u32 %s492_s7, 1  ;;  %s299_s21 = sshll.u32 %s492_s7, 5 }
  0x11   : > { %s138_s15 = sadd.s32 %s296_s14, %s136_s13  ;;  %s147_s22 = sadd.s32 %s299_s21, %s494_s20 }
  0x12   : > { %s297_s16 = sshll.u32 %s138_s15, 2  ;;  %s300_s23 = sshll.u32 %s147_s22, 3 }
  0x13   : > { %s140_s19 = scalar_lea.vmem %s479_s0, %s297_s16  ;;  %s430_s26 = scalar_lea.vmem %s480_s1, %s300_s23 }
  0x14   : > { %v151_v0 = vld [vmem:[%s140_s19] sm:$0xf] }
  0x15   : > { %152 = vxpose.xlu0.b32.start.end [1/1] (short) %v151_v0, 128 }
  0x91   : > { %v168_v1 = vpop.trf.xlu0 }
  0x92   : > { %185 = vst.msk [vmem:[%s430_s26] sm:$0xff] %vm184_vm0, %v168_v1 }
  0x95   : > { %v169_v2 = vpop.trf.xlu0 }
  0x96   : > { %186 = vst.msk [vmem:[%s430_s26 + $0x8] sm:$0xff] %vm184_vm0, %v169_v2 }
  0x99   : > { %v170_v3 = vpop.trf.xlu0 }
  0x9a   : > { %187 = vst.msk [vmem:[%s430_s26 + $0x10] sm:$0xff] %vm184_vm0, %v170_v3 }
  0x9d   : > { %v171_v4 = vpop.trf.xlu0 }
  0x9e   : > { %188 = vst.msk [vmem:[%s430_s26 + $0x18] sm:$0xff] %vm184_vm0, %v171_v4 }
  0xa1   : > { %v172_v5 = vpop.trf.xlu0 }
  0xa2   : > { %189 = vst.msk [vmem:[%s430_s26 + $0x20] sm:$0xff] %vm184_vm0, %v172_v5 }
  0xa5   : > { %v173_v6 = vpop.trf.xlu0 }
  0xa6   : > { %190 = vst.msk [vmem:[%s430_s26 + $0x28] sm:$0xff] %vm184_vm0, %v173_v6 }
  0xa9   : > { %v174_v7 = vpop.trf.xlu0 }
  0xaa   : > { %191 = vst.msk [vmem:[%s430_s26 + $0x30] sm:$0xff] %vm184_vm0, %v174_v7 }
  0xad   : > { %v175_v8 = vpop.trf.xlu0 }
  0xae   : > { %192 = vst.msk [vmem:[%s430_s26 + $0x38] sm:$0xff] %vm184_vm0, %v175_v8 }
  0xb1   : > { %v176_v9 = vpop.trf.xlu0 }
  0xb2   : > { %193 = vst.msk [vmem:[%s430_s26 + $0x40] sm:$0xff] %vm184_vm0, %v176_v9 }
  0xb5   : > { %v177_v10 = vpop.trf.xlu0 }
  0xb6   : > { %194 = vst.msk [vmem:[%s430_s26 + $0x48] sm:$0xff] %vm184_vm0, %v177_v10 }
  0xb9   : > { %v178_v11 = vpop.trf.xlu0 }
  0xba   : > { %195 = vst.msk [vmem:[%s430_s26 + $0x50] sm:$0xff] %vm184_vm0, %v178_v11 }
  0xbd   : > { %v179_v12 = vpop.trf.xlu0 }
  0xbe   : > { %196 = vst.msk [vmem:[%s430_s26 + $0x58] sm:$0xff] %vm184_vm0, %v179_v12 }
  0xc1   : > { %v180_v13 = vpop.trf.xlu0 }
  0xc2   : > { %197 = vst.msk [vmem:[%s430_s26 + $0x60] sm:$0xff] %vm184_vm0, %v180_v13 }
  0xc5   : > { %v181_v14 = vpop.trf.xlu0 }
  0xc6   : > { %198 = vst.msk [vmem:[%s430_s26 + $0x68] sm:$0xff] %vm184_vm0, %v181_v14 }
  0xc9   : > { %v182_v15 = vpop.trf.xlu0 }
  0xca   : > { %199 = vst.msk [vmem:[%s430_s26 + $0x70] sm:$0xff] %vm184_vm0, %v182_v15 }
  0xcd   : > { %v183_v16 = vpop.trf.xlu0 }
  0xce   : > { %200 = vst.msk [vmem:[%s430_s26 + $0x78] sm:$0xff] %vm184_vm0, %v183_v16 }
  0xcf PF: > { %s11_s10 = sadd.s32 1, %s382_s10   ;;  %s481_s6 = smov %s374_s8 }
  0xd0   : > { %p8_p8 = scmp.ge.s32.totalorder %s11_s10, 6   ;;  %s482_s7 = smov %s378_s9 }
  0xd1   : > { %s483_s8 = smov %s486_s11  ;;  %s484_s9 = smov %s490_s12 }
  0xd2   :  { %10 = sbr.rel (!%p8_p8) target bundleno = 3 (0x3), region = 54 }

</bundles_post_ra>
